<compile_context>
chip_gen: v7x
topology: tpu7x:2x2x1
jax: 0.10.0
libtpu: 0.0.40
codegen_flags: <defaults>
</compile_context>

<pallas_src>
import functools
import math

import jax
import jax.numpy as jnp
from jax.experimental import pallas as pl
from jax.experimental.pallas import tpu as pltpu


def _layernorm_kernel(x_ref, o_ref, *, eps: float, groups: int, d_model: int):
    """Normalizes `groups` independent length-d_model segments per tile row.

    x_ref / o_ref: (tile_rows, groups * d_model) VMEM tiles.  The wrapper folds
    several logical rows into the lane axis when d_model is small so loads and
    (more importantly) stores stay lane-dense.
    """
    x = x_ref[...].astype(jnp.float32)
    inv_d = 1.0 / float(d_model)

    if groups == 1:
        # Single-pass mean / E[x^2]: one fewer full-tile f32 temporary than the
        # two-pass (x - mean) formulation (minor cancellation tradeoff, fine in f32).
        mean = jnp.mean(x, axis=-1, keepdims=True)
        meansq = jnp.mean(x * x, axis=-1, keepdims=True)
        var = jnp.maximum(meansq - mean * mean, 0.0)
        inv = jax.lax.rsqrt(var + eps)                     # EUP rsqrt (free slot)
        o_ref[...] = (x * inv - mean * inv).astype(o_ref.dtype)
    else:
        width = groups * d_model
        # Segment-membership matrices (compile-time constants):
        #   seg[i, g]  = 1 iff lane i belongs to logical row g
        #   seg_t      = its transpose, built directly (no in-kernel transpose).
        lane_owner = jax.lax.broadcasted_iota(jnp.int32, (width, groups), 0) // d_model
        grp = jax.lax.broadcasted_iota(jnp.int32, (width, groups), 1)
        seg = (lane_owner == grp).astype(jnp.float32)
        lane_owner_t = jax.lax.broadcasted_iota(jnp.int32, (groups, width), 1) // d_model
        grp_t = jax.lax.broadcasted_iota(jnp.int32, (groups, width), 0)
        seg_t = (lane_owner_t == grp_t).astype(jnp.float32)

        # Segmented sum / sum-of-squares on the MXU (this op is HBM-bound, so the
        # matmuls are hidden behind DMA and keep VPU/XLU slots free).
        ssum = jnp.dot(x, seg, preferred_element_type=jnp.float32)        # (T, G)
        ssq = jnp.dot(x * x, seg, preferred_element_type=jnp.float32)     # (T, G)
        mean = ssum * inv_d
        var = jnp.maximum(ssq * inv_d - mean * mean, 0.0)
        inv = jax.lax.rsqrt(var + eps)

        # Broadcast per-segment stats back to lanes; normalize as
        #   out = x * inv_b - (mean * inv)_b   (avoids keeping (x - mean) live).
        inv_b = jnp.dot(inv, seg_t, preferred_element_type=jnp.float32)
        shift_b = jnp.dot(mean * inv, seg_t, preferred_element_type=jnp.float32)
        o_ref[...] = (x * inv_b - shift_b).astype(o_ref.dtype)


def _round_up(x: int, m: int) -> int:
    return ((x + m - 1) // m) * m


def _vmem_capacity_bytes() -> int:
    try:
        return int(pltpu.get_tpu_info().vmem_capacity_bytes)
    except Exception:
        return 64 * 1024 * 1024  # conservative fallback: v7x per-TensorCore VMEM


def layer_norm(x: jnp.ndarray, eps: float = 1e-8) -> jnp.ndarray:
    """LayerNorm over the last axis, no scale/bias (matches the PyTorch module)."""
    orig_shape = x.shape
    d_model = orig_shape[-1]
    rows = 1
    for s in orig_shape[:-1]:
        rows *= s
    itemsize = jnp.dtype(x.dtype).itemsize

    # ---- lane-dense folding --------------------------------------------------
    # Fold G rows into the lane axis so the tile width is a multiple of 128 and
    # stores are unmasked lane-dense vst's.  (rows, d) -> (rows/G, G*d) is a
    # pure row-major re-view; no data movement in the wrapper.
    groups = 128 // math.gcd(d_model, 128)
    if groups > 1 and rows > 0 and rows % groups == 0:
        rows_f = rows // groups
        width = groups * d_model
    else:
        groups = 1
        rows_f = rows
        width = d_model
    x2 = x.reshape(rows_f, width)

    # ---- tile-size selection (generation-aware VMEM budget) ------------------
    # Sublane packing: 8 rows/vreg for 4-byte dtypes, 16 for bf16, 32 for int8/fp8.
    sublane = {4: 8, 2: 16, 1: 32}.get(itemsize, 8)
    vmem_cap = _vmem_capacity_bytes()
    budget = vmem_cap // 2  # keep half of per-core VMEM as headroom

    # Live bytes per tile row: 2x double-buffered input + 2x output blocks plus
    # ~4 full-width f32 intermediates inside the body.
    bytes_per_row = 4 * width * itemsize + 16 * width
    rows_from_budget = max(1, budget // bytes_per_row)

    # ~1 MiB blocks already reach ~85% of HBM roofline; use 4 MiB for f32 and
    # 2 MiB for narrower dtypes (their f32 temps are relatively larger) to
    # amortize the ~0.35us per-grid-step pipeline overhead.
    block_byte_target = (4 if itemsize >= 4 else 2) * 1024 * 1024
    rows_from_target = max(1, block_byte_target // (width * itemsize))

    tile_rows = min(rows_from_budget, rows_from_target, 2048)
    tile_rows = max(sublane, (tile_rows // sublane) * sublane)
    # TODO(synk): for extreme d_model (100K+ lanes) where even one sublane-high
    # block exceeds the VMEM budget, add a d_model-tiled two-pass reduction axis.

    if tile_rows >= rows_f:
        if rows_f > 2 * sublane:
            # Split into exactly 2 blocks so both v7x TensorCores get work.
            tile_rows = _round_up(pl.cdiv(rows_f, 2), sublane)
        else:
            # Single block covering the whole array (block == array dims, so no
            # sublane-alignment requirement and no ragged block at all).
            tile_rows = rows_f

    num_blocks = pl.cdiv(rows_f, tile_rows)
    if 3 <= num_blocks <= 16 and num_blocks % 2 == 1:
        # Prefer an even block count so v7x's two TensorCores stay balanced.
        tile_rows = max(sublane, _round_up(pl.cdiv(rows_f, num_blocks + 1), sublane))
        num_blocks = pl.cdiv(rows_f, tile_rows)

    # Ragged last block (rows_f % tile_rows != 0) is fine: Pallas masks the
    # out-of-bounds writes and padded rows only ever produce padded rows, so no
    # host-side jnp.pad / slice (which would double HBM traffic) is needed.

    blk_bytes = tile_rows * width * itemsize
    footprint = (4 * blk_bytes                     # double-buffered in + out blocks
                 + 4 * tile_rows * width * 4       # live f32 intermediates
                 + 2 * width * groups * 4)         # segment matrices (grouped path)
    vmem_limit = int(min(max(footprint + (4 << 20), 32 << 20), vmem_cap - (8 << 20)))

    cost = pl.CostEstimate(
        flops=7 * rows * d_model,
        transcendentals=rows,
        bytes_accessed=2 * rows * d_model * itemsize,
    )

    out = pl.pallas_call(
        functools.partial(_layernorm_kernel, eps=eps, groups=groups, d_model=d_model),
        out_shape=jax.ShapeDtypeStruct((rows_f, width), x.dtype),
        grid_spec=pltpu.PrefetchScalarGridSpec(
            num_scalar_prefetch=0,
            grid=(num_blocks,),
            in_specs=[pl.BlockSpec((tile_rows, width), lambda i: (i, 0))],
            out_specs=pl.BlockSpec((tile_rows, width), lambda i: (i, 0)),
        ),
        compiler_params=pltpu.CompilerParams(
            dimension_semantics=("parallel",),
            vmem_limit_bytes=vmem_limit,
        ),
        cost_estimate=cost,
    )(x2)

    return out.reshape(orig_shape)


def _layer_norm_ref(x, eps=1e-8):
    x = x.astype(jnp.float32)
    mean = jnp.mean(x, axis=-1, keepdims=True)
    var = jnp.mean(jnp.square(x - mean), axis=-1, keepdims=True)
    return (x - mean) / jnp.sqrt(var + eps)


if __name__ == "__main__":
    key = jax.random.PRNGKey(0)
    k1, k2, k3, k4, k5 = jax.random.split(key, 5)

    tests = [
        jax.random.normal(k1, (2, 8, 128), dtype=jnp.float32),    # already lane-dense (G=1)
        jax.random.normal(k2, (2, 8, 32), dtype=jnp.float32),     # folds 4 rows -> 128 lanes
        jax.random.normal(k3, (2, 16, 48), dtype=jnp.float32),    # folds 8 rows -> 384 lanes
        jax.random.normal(k4, (3, 5, 32), dtype=jnp.float32),     # ragged rows, fold disabled
        jax.random.normal(k5, (4, 64, 256), dtype=jnp.bfloat16),  # bf16, 2-block grid
    ]

    for x in tests:
        y = jax.block_until_ready(layer_norm(x))
        y_ref = _layer_norm_ref(x)
        assert y.shape == x.shape and y.dtype == x.dtype, x.shape
        tol = 3e-5 if x.dtype == jnp.float32 else 5e-2  # bf16 output rounding
        assert jnp.allclose(y.astype(jnp.float32), y_ref, atol=tol, rtol=tol), x.shape

    print("KERNEL_OK")
</pallas_src>

<mosaic_0001>
module attributes {stable_mosaic.version = 11 : i64} {
  func.func @_layernorm_kernel(%arg0: i32, %arg1: memref<16x128xf32, #tpu.memory_space<vmem>>, %arg2: memref<16x128xf32, #tpu.memory_space<vmem>>) attributes {dimension_semantics = [#tpu.dimension_semantics<parallel>], iteration_bounds = array<i64: 1>, scalar_prefetch = 0 : i64, scratch_operands = 0 : i64, tpu.core_type = #tpu.core_type<tc>, window_params = [{transform_indices = @transform_0, window_bounds = array<i64: 16, 128>}, {transform_indices = @transform_1, window_bounds = array<i64: 16, 128>}]} {
    %c0 = arith.constant 0 : index
    %c0_0 = arith.constant 0 : index
    %0 = vector.load %arg1[%c0, %c0_0] : memref<16x128xf32, #tpu.memory_space<vmem>>, vector<16x128xf32>
    %cst = arith.constant dense<0.000000e+00> : vector<16xf32>
    %1 = vector.multi_reduction <add>, %0, %cst [1] : vector<16x128xf32> to vector<16xf32>
    %2 = vector.shape_cast %1 : vector<16xf32> to vector<16x1xf32>
    %cst_1 = arith.constant 1.280000e+02 : f32
    %3 = vector.broadcast %cst_1 : f32 to vector<16x1xf32>
    %4 = arith.divf %2, %3 : vector<16x1xf32>
    %5 = arith.mulf %0, %0 : vector<16x128xf32>
    %cst_2 = arith.constant dense<0.000000e+00> : vector<16xf32>
    %6 = vector.multi_reduction <add>, %5, %cst_2 [1] : vector<16x128xf32> to vector<16xf32>
    %7 = vector.shape_cast %6 : vector<16xf32> to vector<16x1xf32>
    %cst_3 = arith.constant 1.280000e+02 : f32
    %8 = vector.broadcast %cst_3 : f32 to vector<16x1xf32>
    %9 = arith.divf %7, %8 : vector<16x1xf32>
    %10 = arith.mulf %4, %4 : vector<16x1xf32>
    %11 = arith.subf %9, %10 : vector<16x1xf32>
    %cst_4 = arith.constant 0.000000e+00 : f32
    %12 = vector.broadcast %cst_4 : f32 to vector<16x1xf32>
    %13 = arith.maximumf %11, %12 : vector<16x1xf32>
    %cst_5 = arith.constant 9.99999993E-9 : f32
    %14 = vector.broadcast %cst_5 : f32 to vector<16x1xf32>
    %15 = arith.addf %13, %14 : vector<16x1xf32>
    %16 = math.rsqrt %15 : vector<16x1xf32>
    %17 = vector.broadcast %16 : vector<16x1xf32> to vector<16x128xf32>
    %18 = arith.mulf %0, %17 : vector<16x128xf32>
    %19 = arith.mulf %4, %16 : vector<16x1xf32>
    %20 = vector.broadcast %19 : vector<16x1xf32> to vector<16x128xf32>
    %21 = arith.subf %18, %20 : vector<16x128xf32>
    %c0_6 = arith.constant 0 : index
    %c0_7 = arith.constant 0 : index
    %22 = vector.load %arg2[%c0_6, %c0_7] : memref<16x128xf32, #tpu.memory_space<vmem>>, vector<16x128xf32>
    tpu.vector_store %arg2[%c0_6, %c0_7], %21 {strides = array<i32>} : memref<16x128xf32, #tpu.memory_space<vmem>>, vector<16x128xf32>,
    return
  }
  func.func @transform_0(%arg0: i32) -> (i32, i32) {
    %c0_i32 = arith.constant 0 : i32
    %c0_i32_0 = arith.constant 0 : i32
    return %arg0, %c0_i32 : i32, i32
  }
  func.func @transform_1(%arg0: i32) -> (i32, i32) {
    %c0_i32 = arith.constant 0 : i32
    %c0_i32_0 = arith.constant 0 : i32
    return %arg0, %c0_i32 : i32, i32
  }
}

</mosaic_0001>

<bundles_post_ra>
// kernel: tpu_custom_call.1
= control target key start
LH: loop header
LB: loop body
LE: loop exit
PB: predicated region body
PF: predicated region fallthrough
CT: control target
= control target key end

     0   :  { %6 = vsyncpa [#allocation3], 0  ;;  %s175_s0 = inlined_call_operand.hbm [shape: f32[16,128], index: 0, kind: input, shape index: {}]   ;;  %s176_s1 = inlined_call_operand.hbm [shape: f32[16,128], index: 1, kind: output, shape index: {}]  }
   0x1   :  { %7 = vsyncpa [#allocation4], 0  ;;  %s131_s6 = smov [#allocation2]   ;;  %s83_s10 = scalar_lea.hbm %s175_s0, 256 }
   0x2   :  { %s13_s7 = sshll.u32 %s131_s6, 4  ;;  %p84_p0 = scmp.ne.s32.totalorder %s175_s0, %s83_s10  ;;  %s14_s7 = int_to_ptr.vmem [resolvable:$true] %s13_s7 }
   0x3   :  { %p87_p1 = scmp.lt.u32.totalorder %s83_s10, %s175_s0 }
   0x5   :  { %p89_p2 = pnand %p87_p1, %p84_p0 }
   0x7   :  { %92 = shalt.err (!%p89_p2)
}
   0x8   :  { %s93_s15 = scalar_lea.vmem %s14_s7, 256  ;;  %p98_p4 = scmp.lt.s32.totalorder %s14_s7, %s14_s7 }
   0x9   :  { %p94_p3 = scmp.ne.s32.totalorder %s14_s7, %s93_s15  ;;  %p99_p5 = scmp.lt.s32.totalorder %s93_s15, %s93_s15 }
   0xb   :  { %p100_p6 = por %p99_p5, %p98_p4 }
   0xd   :  { %p101_p7 = pnand %p100_p6, %p94_p3 }
   0xf   :  { %104 = shalt.err (!%p101_p7)
}
  0x10   :  { %s132_s16 = smov 128   ;;  %s133_s17 = smov 8  }
  0x11   :  { %19 = dma.hbm_to_vmem [thread:$0]  %s175_s0, 256, %s14_s7, [#allocation3], %s132_s16, %s132_s16, %s133_s17  }
  0x12   :  { %127 = dma.done.wait [#allocation3], 256  }
  0x13   :  { %128 = vsyncadd [#allocation3], 4294967040  ;;  %v23_v0 = vld [vmem:[#allocation2] sm:$0xff]  ;;  %v24_v1 = vld [vmem:[#allocation2 + $0x8] sm:$0xff]  ;;  %s134_s0 = smov [#allocation5]  }
  0x14   :  { %25 = vadd.xlane.f32.xlu0 %v23_v0  ;;  %v32_v2 = vmul.f32 %v23_v0, %v23_v0  ;;  %v33_v3 = vmul.f32 %v24_v1, %v24_v1  ;;  %s63_s20 = sshll.u32 %s134_s0, 4  ;;  %s64_s20 = int_to_ptr.vmem [resolvable:$true] %s63_s20 }
  0x15   :  { %s105_s21 = scalar_lea.vmem %s64_s20, 256  ;;  %p110_p9 = scmp.lt.s32.totalorder %s64_s20, %s64_s20 }
  0x16   :  { %34 = vadd.xlane.f32.xlu1 %v32_v2  ;;  %p106_p8 = scmp.ne.s32.totalorder %s64_s20, %s105_s21  ;;  %p111_p10 = scmp.lt.s32.totalorder %s105_s21, %s105_s21 }
  0x18   :  { %27 = vadd.xlane.f32.xlu0 %v24_v1  ;;  %p112_p11 = por %p111_p10, %p110_p9 }
  0x1a   :  { %36 = vadd.xlane.f32.xlu1 %v33_v3  ;;  %p113_p12 = pnand %p112_p11, %p106_p8 }
  0xa1   :  { %v26_v4 = vpop.xlane.xlu0 %25 }
  0xa2   :  { %v30_v5 = vmul.f32 0.0078125, %v26_v4 }
  0xa3   :  { %v35_v6 = vpop.xlane.xlu1 %34 }
  0xa4   :  { %v40_v7 = vmul.f32 %v30_v5, %v30_v5  ;;  %v38_v8 = vmul.f32 0.0078125, %v35_v6 }
  0xa5   :  { %v28_v9 = vpop.xlane.xlu0 %27 }
  0xa6   :  { %v42_v10 = vsub.f32 %v38_v8, %v40_v7  ;;  %v31_v11 = vmul.f32 0.0078125, %v28_v9 }
  0xa7   :  { %v37_v12 = vpop.xlane.xlu1 %36 }
  0xa8   :  { %v44_v13 = vmax.f32 %v42_v10, 0.0  ;;  %v41_v14 = vmul.f32 %v31_v11, %v31_v11  ;;  %v39_v15 = vmul.f32 0.0078125, %v37_v12 }
  0xaa   :  { %v46_v16 = vadd.f32 1e-08, %v44_v13  ;;  %v43_v17 = vsub.f32 %v39_v15, %v41_v14 }
  0xac   :  { %79 = vrsqrt.f32 %v46_v16  ;;  %v45_v18 = vmax.f32 %v43_v17, 0.0 }
  0xae   :  { %v47_v19 = vadd.f32 1e-08, %v45_v18 }
  0xb0   :  { %81 = vrsqrt.f32 %v47_v19 }
  0xb6   :  { %v80_v20 = vpop.eup %79 }
  0xb7   :  { %v50_v21 = vmul.f32 %v80_v20, %v23_v0  ;;  %v52_v22 = vmul.f32 %v80_v20, %v30_v5 }
  0xb9   :  { %v54_v23 = vsub.f32 %v50_v21, %v52_v22 }
  0xba   :  { %v82_v24 = vpop.eup %81 }
  0xbb   :  { %v51_v25 = vmul.f32 %v82_v24, %v24_v1  ;;  %v53_v26 = vmul.f32 %v82_v24, %v31_v11  ;;  %56 = vst [vmem:[#allocation5] sm:$0xff] %v54_v23 }
  0xbd   :  { %v55_v27 = vsub.f32 %v51_v25, %v53_v26 }
  0xbf   :  { %57 = vst [vmem:[#allocation5 + $0x8] sm:$0xff] %v55_v27 }
  0xc0   :  { %116 = shalt.err (!%p113_p12)
}
  0xc1   :  { %s117_s24 = scalar_lea.hbm %s176_s1, 256 }
  0xc2   :  { %p118_p13 = scmp.ne.s32.totalorder %s176_s1, %s117_s24  ;;  %p121_p0 = scmp.lt.u32.totalorder %s117_s24, %s176_s1 }
  0xc4   :  { %p123_p1 = pnand %p121_p0, %p118_p13 }
  0xc6   :  { %126 = shalt.err (!%p123_p1)
}
  0xc7   :  { %69 = dma.vmem_to_hbm [thread:$0]  %s64_s20, 256, %s176_s1, [#allocation4], %s132_s16, %s132_s16, %s133_s17  }
  0xc8   :  { %129 = dma.done.wait [#allocation4], 256  }
  0xc9   :  { %130 = vsyncadd [#allocation4], 4294967040 }
  0xca   :  { %73 = vsyncpa [#allocation3], 1 }
  0xcb   :  { %74 = vsyncpa [#allocation4], 1 }

</bundles_post_ra>
